<compile_context>
chip_gen: v7x
topology: tpu7x:2x2x1
jax: 0.10.0
libtpu: 0.0.40
codegen_flags: <defaults>
</compile_context>

<pallas_src>
import functools
import math

import jax
import jax.numpy as jnp
from jax.experimental import pallas as pl
from jax.experimental.pallas import tpu as pltpu

_LN_EPS = 1e-5
_FALLBACK_VMEM_CAPACITY = 64 * 1024 * 1024     # assume v7x (smallest VMEM) if query fails
_VMEM_HEADROOM_BYTES = 2 * 1024 * 1024         # Mosaic internal scratch / slack
_MAX_BLOCK_ROWS = 4096


def _vmem_budget_bytes():
    """Generation-aware VMEM budget: 3/4 of physical capacity."""
    try:
        info = pltpu.get_tpu_info()
        cap = int(getattr(info, "vmem_capacity_bytes", _FALLBACK_VMEM_CAPACITY))
    except Exception:
        cap = _FALLBACK_VMEM_CAPACITY
    return (cap * 3) // 4          # 48 MiB on v7x (64 MiB), 96 MiB on v5e/v6e (128 MiB)


# ----------------------------- kernel math ---------------------------------


def _layer_norm(v, gamma, beta):
    # Single-pass LayerNorm: sum(x) and sum(x*x) computed together, clamp
    # var >= 0 to guard against cancellation (review item).
    mu = jnp.mean(v, axis=-1, keepdims=True)
    ms = jnp.mean(v * v, axis=-1, keepdims=True)
    var = jnp.maximum(ms - mu * mu, 0.0)
    return (v - mu) * jax.lax.rsqrt(var + _LN_EPS) * gamma + beta


def _block_math(x, w_fft, b_fft, w2, b2, w3, b3, g1, be1, g2, be2):
    """Shared math for the kernel body and the mirrored numerics reference.

    x is f32 (rows, D); w_fft is f32, w2/w3 may be bf16 (MXU inputs);
    biases / LN params are f32.
    """
    # LayerNorm1 + (fft -> cat(real, imag) -> Linear) folded into one matmul.
    n1 = _layer_norm(x, g1, be1)
    y = jnp.dot(n1.astype(w_fft.dtype), w_fft,
                preferred_element_type=jnp.float32) + b_fft

    # Residual 1.  Dropout(p=0.0) is the identity.
    x2 = x + y

    # LayerNorm2 + MLP (Linear -> ReLU -> Linear) + residual 2.
    n2 = _layer_norm(x2, g2, be2)
    h = jnp.dot(n2.astype(w2.dtype), w2, preferred_element_type=jnp.float32) + b2
    h = jnp.maximum(h, 0.0)
    lin = jnp.dot(h.astype(w3.dtype), w3, preferred_element_type=jnp.float32) + b3
    return n2 + lin


def _fourier_block_kernel(x_ref, wf_ref, w2_ref, b2_ref, w3_ref, slab_ref, o_ref):
    slab = slab_ref[...]                       # (8, D) packed small params (f32)
    b_fft, b3 = slab[0:1, :], slab[1:2, :]
    g1, be1 = slab[2:3, :], slab[3:4, :]
    g2, be2 = slab[4:5, :], slab[5:6, :]
    out = _block_math(
        x_ref[...].astype(jnp.float32),
        wf_ref[...], b_fft,
        w2_ref[...], b2_ref[...],
        w3_ref[...], b3,
        g1, be1, g2, be2,
    )
    o_ref[...] = out.astype(o_ref.dtype)


# --------------------------- VMEM accounting --------------------------------


def _round_up(v, m):
    return ((v + m - 1) // m) * m


def _per_row_vmem_bytes(d, h, x_itemsize, out_itemsize, mlp_itemsize, x_buffers):
    nb = 2 if x_buffers is None else x_buffers
    io = nb * d * x_itemsize + 2 * d * out_itemsize       # pipelined in/out row tiles
    acts = 4 * (7 * d + h)                                # f32: x, n1, y, x2, n2, lin, out + h
    casts = mlp_itemsize * (d + h)                        # bf16 copies of n2 and h for the MXU
    return io + acts + casts


def _param_vmem_bytes(d, h, wf_itemsize, mlp_itemsize, weight_buffers):
    nb = 2 if weight_buffers is None else weight_buffers
    big = wf_itemsize * d * d + mlp_itemsize * 2 * d * h
    small = 4 * (8 * d + 8 * h)                           # (8,D) slab + (1,H) bias padded to (8,H)
    return nb * (big + small)


def _pick_block_rows(n_rows8, d, h, x_itemsize, out_itemsize, wf_itemsize,
                     mlp_itemsize, budget, x_buffers, weight_buffers):
    per_row = _per_row_vmem_bytes(d, h, x_itemsize, out_itemsize, mlp_itemsize,
                                  x_buffers)
    fixed = (_param_vmem_bytes(d, h, wf_itemsize, mlp_itemsize, weight_buffers)
             + _VMEM_HEADROOM_BYTES)
    avail = budget - fixed
    if avail < 8 * per_row:
        raise ValueError(
            f"resident weights ({fixed / 2**20:.1f} MiB) leave no room for an "
            f"8-row tile under the {budget / 2**20:.0f} MiB VMEM budget; "
            "tile input_dim/hidden_dim (K/N weight tiling).")
    cap = min(_MAX_BLOCK_ROWS, (avail // per_row) // 8 * 8)
    block = min(cap, n_rows8)
    # Guarantee >= 2 grid steps (v7x megacore) whenever there is more than one
    # sublane-tile of rows.
    if block == n_rows8 and n_rows8 > 8:
        block = _round_up(-(-n_rows8 // 2), 8)
    return max(8, block)


# ------------------------------- wrapper ------------------------------------


@functools.partial(
    jax.jit,
    static_argnames=("block_rows", "vmem_budget", "x_buffers", "weight_buffers"))
def _fourier_block_rows(x2d, w_fft, w2, b2, w3, slab, *, block_rows, vmem_budget,
                        x_buffers=None, weight_buffers=None):
    n_rows, d = x2d.shape
    h = w2.shape[1]
    grid = (n_rows // block_rows,)             # rows pre-padded to a multiple

    x_isz = x2d.dtype.itemsize
    wf_isz = w_fft.dtype.itemsize
    mlp_isz = w2.dtype.itemsize

    est = (block_rows * _per_row_vmem_bytes(d, h, x_isz, x_isz, mlp_isz, x_buffers)
           + _param_vmem_bytes(d, h, wf_isz, mlp_isz, weight_buffers)
           + _VMEM_HEADROOM_BYTES)
    if est > vmem_budget:
        raise ValueError(
            f"working set {est / 2**20:.1f} MiB exceeds the "
            f"{vmem_budget / 2**20:.0f} MiB VMEM budget; reduce block_rows or "
            "tile input_dim/hidden_dim (K/N weight tiling).")

    cost = pl.CostEstimate(
        flops=2 * n_rows * (d * d + 2 * d * h),
        transcendentals=2 * n_rows,                        # two rsqrt per row
        bytes_accessed=(2 * n_rows * d * x_isz
                        + wf_isz * d * d + mlp_isz * 2 * d * h),
    )

    def _spec(shape, index_map, buffers):
        if buffers is None:
            return pl.BlockSpec(shape, index_map)
        return pl.BlockSpec(shape, index_map, pipeline_mode=pl.Buffered(buffers))

    inv = lambda i: (0, 0)          # grid-invariant params: fetched once
    row = lambda i: (i, 0)

    return pl.pallas_call(
        _fourier_block_kernel,
        out_shape=jax.ShapeDtypeStruct((n_rows, d), x2d.dtype),
        grid_spec=pltpu.PrefetchScalarGridSpec(
            num_scalar_prefetch=0,
            grid=grid,
            in_specs=[
                _spec((block_rows, d), row, x_buffers),    # x row tile (native dtype)
                _spec((d, d), inv, weight_buffers),        # fused DFT+fftout weight (f32)
                _spec((d, h), inv, weight_buffers),        # W2 (in, out)
                _spec((1, h), inv, weight_buffers),        # b2
                _spec((h, d), inv, weight_buffers),        # W3 (in, out)
                _spec((8, d), inv, weight_buffers),        # packed b_fft/b3/LN params
            ],
            out_specs=pl.BlockSpec((block_rows, d), row),
        ),
        compiler_params=pltpu.CompilerParams(
            dimension_semantics=("parallel",),             # megacore-shardable
            vmem_limit_bytes=int(vmem_budget),
        ),
        cost_estimate=cost,
    )(x2d, w_fft, w2, b2, w3, slab)


def _dft_matrices(d):
    # Exact integer (n*k) % d keeps angles in [0, 2*pi) -> full f32 accuracy.
    n = jnp.arange(d, dtype=jnp.int32)
    nk = (n[:, None] * n[None, :]) % d
    ang = (2.0 * jnp.pi / d) * nk.astype(jnp.float32)
    return jnp.cos(ang), jnp.sin(ang)          # C[n, k], S[n, k]


def prepare_params(params, d, *, mlp_dtype=jnp.bfloat16,
                   fft_weight_dtype=jnp.float32):
    """PyTorch-layout params -> kernel operands (fused DFT weight + packed slab)."""
    # fft(n1)[k] = sum_n n1[n] * (cos - i sin)  =>  real = n1 @ C, imag = -(n1 @ S)
    # cat(real, imag) @ [Wr; Wi] + b  ==  n1 @ (C @ Wr - S @ Wi) + b
    cos_m, sin_m = _dft_matrices(d)
    w_t = params["w_fftout"].T.astype(jnp.float32)                 # (2D, D)
    w_r, w_i = w_t[:d], w_t[d:]
    w_fft = (cos_m @ w_r - sin_m @ w_i).astype(fft_weight_dtype)   # (D, D), keep f32

    slab = jnp.zeros((8, d), jnp.float32)
    slab = slab.at[0].set(params["b_fftout"].astype(jnp.float32))
    slab = slab.at[1].set(params["b3"].astype(jnp.float32))
    slab = slab.at[2].set(params["ln1_g"].astype(jnp.float32))
    slab = slab.at[3].set(params["ln1_b"].astype(jnp.float32))
    slab = slab.at[4].set(params["ln2_g"].astype(jnp.float32))
    slab = slab.at[5].set(params["ln2_b"].astype(jnp.float32))

    return (
        w_fft,
        params["w2"].T.astype(mlp_dtype),                          # (D, H)
        params["b2"].reshape(1, -1).astype(jnp.float32),           # (1, H)
        params["w3"].T.astype(mlp_dtype),                          # (H, D)
        slab,                                                      # (8, D)
    )


def fourier_block(x, params, *, mlp_dtype=jnp.bfloat16,
                  fft_weight_dtype=jnp.float32, block_rows=None,
                  x_buffers=None, weight_buffers=None):
    """FourierBLock forward (mode='fft', leaky_relu=False, dropout=0.0)."""
    d = x.shape[-1]
    w_fft, w2, b2, w3, slab = prepare_params(
        params, d, mlp_dtype=mlp_dtype, fft_weight_dtype=fft_weight_dtype)

    # Keep activations in their native dtype at the HBM boundary; the kernel
    # upcasts to f32 internally and the output matches x.dtype.
    x2d = x.reshape(-1, d)
    n_rows = x2d.shape[0]
    h = w2.shape[1]
    budget = _vmem_budget_bytes()
    x_isz = x2d.dtype.itemsize

    if block_rows is None:
        block_rows = _pick_block_rows(
            _round_up(n_rows, 8), d, h, x_isz, x_isz,
            jnp.dtype(fft_weight_dtype).itemsize, jnp.dtype(mlp_dtype).itemsize,
            budget, x_buffers, weight_buffers)
    else:
        block_rows = _round_up(block_rows, 8)

    padded = _round_up(n_rows, block_rows)
    if padded != n_rows:
        x2d = jnp.pad(x2d, ((0, padded - n_rows), (0, 0)))

    out = _fourier_block_rows(
        x2d, w_fft, w2, b2, w3, slab,
        block_rows=block_rows, vmem_budget=int(budget),
        x_buffers=x_buffers, weight_buffers=weight_buffers)
    return out[:n_rows].reshape(x.shape)


# --------------------------- init & reference -------------------------------


def init_params(key, input_dim, hidden_dim):
    """nn.Linear / nn.LayerNorm default-style init, PyTorch (out, in) layout."""
    ks = jax.random.split(key, 6)

    def linear(kw, kb, fan_in, fan_out):
        bound = 1.0 / math.sqrt(fan_in)
        w = jax.random.uniform(kw, (fan_out, fan_in), jnp.float32, -bound, bound)
        b = jax.random.uniform(kb, (fan_out,), jnp.float32, -bound, bound)
        return w, b

    w_fftout, b_fftout = linear(ks[0], ks[1], 2 * input_dim, input_dim)
    w2, b2 = linear(ks[2], ks[3], input_dim, hidden_dim)
    w3, b3 = linear(ks[4], ks[5], hidden_dim, input_dim)
    d = input_dim
    return dict(
        w_fftout=w_fftout, b_fftout=b_fftout,
        w2=w2, b2=b2, w3=w3, b3=b3,
        ln1_g=jnp.ones((d,), jnp.float32), ln1_b=jnp.zeros((d,), jnp.float32),
        ln2_g=jnp.ones((d,), jnp.float32), ln2_b=jnp.zeros((d,), jnp.float32),
    )


def _layer_norm_ref(v, gamma, beta):
    mu = jnp.mean(v, axis=-1, keepdims=True)
    c = v - mu
    var = jnp.mean(c * c, axis=-1, keepdims=True)
    return c * jax.lax.rsqrt(var + _LN_EPS) * gamma + beta


def fourier_block_reference(x, params):
    """Faithful f32 translation of the PyTorch forward (real fft, unfused)."""
    xf = x.astype(jnp.float32)
    n1 = _layer_norm_ref(xf, params["ln1_g"], params["ln1_b"])
    f = jnp.fft.fft(n1, axis=-1)
    feats = jnp.concatenate([jnp.real(f), jnp.imag(f)], axis=-1).astype(jnp.float32)
    y = feats @ params["w_fftout"].T + params["b_fftout"]
    x2 = xf + y
    n2 = _layer_norm_ref(x2, params["ln2_g"], params["ln2_b"])
    h = jnp.maximum(n2 @ params["w2"].T + params["b2"], 0.0)
    lin = h @ params["w3"].T + params["b3"]
    return n2 + lin


# --------------------------------- demo --------------------------------------

if __name__ == "__main__":
    key = jax.random.PRNGKey(0)
    k_x, k_p = jax.random.split(key)

    # input_dim is the seq_len the fft/LayerNorm act over; keep it 128 so all
    # HBM-facing tiles are lane-dense.  Rows = batch * channels = 8.
    batch, channels, input_dim, hidden_dim = 2, 4, 128, 256
    x = jax.random.normal(k_x, (batch, channels, input_dim), jnp.float32)
    params = init_params(k_p, input_dim, hidden_dim)

    out = jax.block_until_ready(fourier_block(x, params))
    assert out.shape == x.shape and out.dtype == x.dtype
    assert bool(jnp.all(jnp.isfinite(out)))

    # (1) Tight numerics check vs a jnp mirror of the exact kernel math
    #     (same fused f32 DFT weight / bf16 MLP weights) -> only MXU
    #     accumulation-order noise.
    w_fft, w2, b2, w3, slab = prepare_params(params, input_dim)
    mirror = _block_math(
        x.reshape(-1, input_dim).astype(jnp.float32),
        w_fft, slab[0:1], w2, b2, w3, slab[1:2],
        slab[2:3], slab[3:4], slab[4:5], slab[5:6],
    ).reshape(x.shape)
    assert jnp.allclose(out.astype(jnp.float32), mirror, atol=5e-3, rtol=5e-3)

    # (2) Semantic check vs a faithful f32 reference of the PyTorch forward
    #     (true fft, unfused linears); the f32 fused DFT weight keeps this
    #     tight, remaining slack covers the bf16 W2/W3 MXU path.
    ref = fourier_block_reference(x, params)
    assert jnp.allclose(out.astype(jnp.float32), ref, atol=5e-2, rtol=5e-2)

    print("KERNEL_OK")
</pallas_src>

<mosaic_0001>
module attributes {stable_mosaic.version = 11 : i64} {
  func.func @_fourier_block_kernel(%arg0: i32, %arg1: memref<8x128xf32, #tpu.memory_space<vmem>>, %arg2: memref<128x128xf32, #tpu.memory_space<vmem>>, %arg3: memref<128x256xbf16, #tpu.memory_space<vmem>>, %arg4: memref<1x256xf32, #tpu.memory_space<vmem>>, %arg5: memref<256x128xbf16, #tpu.memory_space<vmem>>, %arg6: memref<8x128xf32, #tpu.memory_space<vmem>>, %arg7: memref<8x128xf32, #tpu.memory_space<vmem>>) attributes {dimension_semantics = [#tpu.dimension_semantics<parallel>], iteration_bounds = array<i64: 1>, scalar_prefetch = 0 : i64, scratch_operands = 0 : i64, tpu.core_type = #tpu.core_type<tc>, window_params = [{transform_indices = @transform_0, window_bounds = array<i64: 8, 128>}, {pipeline_mode = #tpu.pipeline_mode<synchronous>, transform_indices = @transform_1, window_bounds = array<i64: 128, 128>}, {pipeline_mode = #tpu.pipeline_mode<synchronous>, transform_indices = @transform_2, window_bounds = array<i64: 128, 256>}, {pipeline_mode = #tpu.pipeline_mode<synchronous>, transform_indices = @transform_3, window_bounds = array<i64: 1, 256>}, {pipeline_mode = #tpu.pipeline_mode<synchronous>, transform_indices = @transform_4, window_bounds = array<i64: 256, 128>}, {pipeline_mode = #tpu.pipeline_mode<synchronous>, transform_indices = @transform_5, window_bounds = array<i64: 8, 128>}, {transform_indices = @transform_6, window_bounds = array<i64: 8, 128>}]} {
    %c0 = arith.constant 0 : index
    %c0_0 = arith.constant 0 : index
    %0 = vector.load %arg6[%c0, %c0_0] : memref<8x128xf32, #tpu.memory_space<vmem>>, vector<8x128xf32>
    %1 = vector.extract_strided_slice %0 {offsets = [0, 0], sizes = [1, 128], strides = [1, 1]} : vector<8x128xf32> to vector<1x128xf32>
    %2 = vector.extract_strided_slice %0 {offsets = [1, 0], sizes = [1, 128], strides = [1, 1]} : vector<8x128xf32> to vector<1x128xf32>
    %3 = vector.extract_strided_slice %0 {offsets = [2, 0], sizes = [1, 128], strides = [1, 1]} : vector<8x128xf32> to vector<1x128xf32>
    %4 = vector.extract_strided_slice %0 {offsets = [3, 0], sizes = [1, 128], strides = [1, 1]} : vector<8x128xf32> to vector<1x128xf32>
    %5 = vector.extract_strided_slice %0 {offsets = [4, 0], sizes = [1, 128], strides = [1, 1]} : vector<8x128xf32> to vector<1x128xf32>
    %6 = vector.extract_strided_slice %0 {offsets = [5, 0], sizes = [1, 128], strides = [1, 1]} : vector<8x128xf32> to vector<1x128xf32>
    %c0_1 = arith.constant 0 : index
    %c0_2 = arith.constant 0 : index
    %7 = vector.load %arg1[%c0_1, %c0_2] : memref<8x128xf32, #tpu.memory_space<vmem>>, vector<8x128xf32>
    %c0_3 = arith.constant 0 : index
    %c0_4 = arith.constant 0 : index
    %8 = vector.load %arg2[%c0_3, %c0_4] : memref<128x128xf32, #tpu.memory_space<vmem>>, vector<128x128xf32>
    %c0_5 = arith.constant 0 : index
    %c0_6 = arith.constant 0 : index
    %9 = vector.load %arg3[%c0_5, %c0_6] : memref<128x256xbf16, #tpu.memory_space<vmem>>, vector<128x256xbf16>
    %c0_7 = arith.constant 0 : index
    %c0_8 = arith.constant 0 : index
    %10 = vector.load %arg4[%c0_7, %c0_8] : memref<1x256xf32, #tpu.memory_space<vmem>>, vector<1x256xf32>
    %c0_9 = arith.constant 0 : index
    %c0_10 = arith.constant 0 : index
    %11 = vector.load %arg5[%c0_9, %c0_10] : memref<256x128xbf16, #tpu.memory_space<vmem>>, vector<256x128xbf16>
    %cst = arith.constant dense<0.000000e+00> : vector<8xf32>
    %12 = vector.multi_reduction <add>, %7, %cst [1] : vector<8x128xf32> to vector<8xf32>
    %13 = vector.shape_cast %12 : vector<8xf32> to vector<8x1xf32>
    %cst_11 = arith.constant 1.280000e+02 : f32
    %14 = vector.broadcast %cst_11 : f32 to vector<8x1xf32>
    %15 = arith.divf %13, %14 : vector<8x1xf32>
    %16 = arith.mulf %7, %7 : vector<8x128xf32>
    %cst_12 = arith.constant dense<0.000000e+00> : vector<8xf32>
    %17 = vector.multi_reduction <add>, %16, %cst_12 [1] : vector<8x128xf32> to vector<8xf32>
    %18 = vector.shape_cast %17 : vector<8xf32> to vector<8x1xf32>
    %cst_13 = arith.constant 1.280000e+02 : f32
    %19 = vector.broadcast %cst_13 : f32 to vector<8x1xf32>
    %20 = arith.divf %18, %19 : vector<8x1xf32>
    %21 = arith.mulf %15, %15 : vector<8x1xf32>
    %22 = arith.subf %20, %21 : vector<8x1xf32>
    %cst_14 = arith.constant 0.000000e+00 : f32
    %23 = vector.broadcast %cst_14 : f32 to vector<8x1xf32>
    %24 = arith.maximumf %22, %23 : vector<8x1xf32>
    %25 = vector.broadcast %15 : vector<8x1xf32> to vector<8x128xf32>
    %26 = arith.subf %7, %25 : vector<8x128xf32>
    %cst_15 = arith.constant 9.99999974E-6 : f32
    %27 = vector.broadcast %cst_15 : f32 to vector<8x1xf32>
    %28 = arith.addf %24, %27 : vector<8x1xf32>
    %29 = math.rsqrt %28 : vector<8x1xf32>
    %30 = vector.broadcast %29 : vector<8x1xf32> to vector<8x128xf32>
    %31 = arith.mulf %26, %30 : vector<8x128xf32>
    %32 = vector.broadcast %3 : vector<1x128xf32> to vector<8x128xf32>
    %33 = arith.mulf %31, %32 : vector<8x128xf32>
    %34 = vector.broadcast %4 : vector<1x128xf32> to vector<8x128xf32>
    %35 = arith.addf %33, %34 : vector<8x128xf32>
    %cst_16 = arith.constant dense<0.000000e+00> : vector<8x128xf32>
    %36 = tpu.matmul %35, %8, %cst_16 {dimension_numbers = #tpu.dot_dimension_numbers<[1], [0], [0], [1], [0, 0, 1, 1], [], []>} : vector<8x128xf32>, vector<128x128xf32>, vector<8x128xf32> -> vector<8x128xf32>
    %37 = vector.broadcast %1 : vector<1x128xf32> to vector<8x128xf32>
    %38 = arith.addf %36, %37 : vector<8x128xf32>
    %39 = arith.addf %7, %38 : vector<8x128xf32>
    %cst_17 = arith.constant dense<0.000000e+00> : vector<8xf32>
    %40 = vector.multi_reduction <add>, %39, %cst_17 [1] : vector<8x128xf32> to vector<8xf32>
    %41 = vector.shape_cast %40 : vector<8xf32> to vector<8x1xf32>
    %cst_18 = arith.constant 1.280000e+02 : f32
    %42 = vector.broadcast %cst_18 : f32 to vector<8x1xf32>
    %43 = arith.divf %41, %42 : vector<8x1xf32>
    %44 = arith.mulf %39, %39 : vector<8x128xf32>
    %cst_19 = arith.constant dense<0.000000e+00> : vector<8xf32>
    %45 = vector.multi_reduction <add>, %44, %cst_19 [1] : vector<8x128xf32> to vector<8xf32>
    %46 = vector.shape_cast %45 : vector<8xf32> to vector<8x1xf32>
    %cst_20 = arith.constant 1.280000e+02 : f32
    %47 = vector.broadcast %cst_20 : f32 to vector<8x1xf32>
    %48 = arith.divf %46, %47 : vector<8x1xf32>
    %49 = arith.mulf %43, %43 : vector<8x1xf32>
    %50 = arith.subf %48, %49 : vector<8x1xf32>
    %cst_21 = arith.constant 0.000000e+00 : f32
    %51 = vector.broadcast %cst_21 : f32 to vector<8x1xf32>
    %52 = arith.maximumf %50, %51 : vector<8x1xf32>
    %53 = vector.broadcast %43 : vector<8x1xf32> to vector<8x128xf32>
    %54 = arith.subf %39, %53 : vector<8x128xf32>
    %cst_22 = arith.constant 9.99999974E-6 : f32
    %55 = vector.broadcast %cst_22 : f32 to vector<8x1xf32>
    %56 = arith.addf %52, %55 : vector<8x1xf32>
    %57 = math.rsqrt %56 : vector<8x1xf32>
    %58 = vector.broadcast %57 : vector<8x1xf32> to vector<8x128xf32>
    %59 = arith.mulf %54, %58 : vector<8x128xf32>
    %60 = vector.broadcast %5 : vector<1x128xf32> to vector<8x128xf32>
    %61 = arith.mulf %59, %60 : vector<8x128xf32>
    %62 = vector.broadcast %6 : vector<1x128xf32> to vector<8x128xf32>
    %63 = arith.addf %61, %62 : vector<8x128xf32>
    %64 = arith.truncf %63 : vector<8x128xf32> to vector<8x128xbf16>
    %cst_23 = arith.constant dense<0.000000e+00> : vector<8x256xf32>
    %65 = tpu.matmul %64, %9, %cst_23 {dimension_numbers = #tpu.dot_dimension_numbers<[1], [0], [0], [1], [0, 0, 1, 1], [], []>} : vector<8x128xbf16>, vector<128x256xbf16>, vector<8x256xf32> -> vector<8x256xf32>
    %66 = vector.broadcast %10 : vector<1x256xf32> to vector<8x256xf32>
    %67 = arith.addf %65, %66 : vector<8x256xf32>
    %cst_24 = arith.constant 0.000000e+00 : f32
    %68 = vector.broadcast %cst_24 : f32 to vector<8x256xf32>
    %69 = arith.maximumf %67, %68 : vector<8x256xf32>
    %70 = arith.truncf %69 : vector<8x256xf32> to vector<8x256xbf16>
    %cst_25 = arith.constant dense<0.000000e+00> : vector<8x128xf32>
    %71 = tpu.matmul %70, %11, %cst_25 {dimension_numbers = #tpu.dot_dimension_numbers<[1], [0], [0], [1], [0, 0, 1, 1], [], []>} : vector<8x256xbf16>, vector<256x128xbf16>, vector<8x128xf32> -> vector<8x128xf32>
    %72 = vector.broadcast %2 : vector<1x128xf32> to vector<8x128xf32>
    %73 = arith.addf %71, %72 : vector<8x128xf32>
    %74 = arith.addf %63, %73 : vector<8x128xf32>
    %c0_26 = arith.constant 0 : index
    %c0_27 = arith.constant 0 : index
    %75 = vector.load %arg7[%c0_26, %c0_27] : memref<8x128xf32, #tpu.memory_space<vmem>>, vector<8x128xf32>
    tpu.vector_store %arg7[%c0_26, %c0_27], %74 {strides = array<i32>} : memref<8x128xf32, #tpu.memory_space<vmem>>, vector<8x128xf32>,
    return
  }
  func.func @transform_0(%arg0: i32) -> (i32, i32) {
    %c0_i32 = arith.constant 0 : i32
    %c0_i32_0 = arith.constant 0 : i32
    return %arg0, %c0_i32 : i32, i32
  }
  func.func @transform_1(%arg0: i32) -> (i32, i32) {
    %c0_i32 = arith.constant 0 : i32
    %c0_i32_0 = arith.constant 0 : i32
    %c0_i32_1 = arith.constant 0 : i32
    return %c0_i32, %c0_i32_0 : i32, i32
  }
  func.func @transform_2(%arg0: i32) -> (i32, i32) {
    %c0_i32 = arith.constant 0 : i32
    %c0_i32_0 = arith.constant 0 : i32
    %c0_i32_1 = arith.constant 0 : i32
    return %c0_i32, %c0_i32_0 : i32, i32
  }
  func.func @transform_3(%arg0: i32) -> (i32, i32) {
    %c0_i32 = arith.constant 0 : i32
    %c0_i32_0 = arith.constant 0 : i32
    %c0_i32_1 = arith.constant 0 : i32
    return %c0_i32, %c0_i32_0 : i32, i32
  }
  func.func @transform_4(%arg0: i32) -> (i32, i32) {
    %c0_i32 = arith.constant 0 : i32
    %c0_i32_0 = arith.constant 0 : i32
    %c0_i32_1 = arith.constant 0 : i32
    return %c0_i32, %c0_i32_0 : i32, i32
  }
  func.func @transform_5(%arg0: i32) -> (i32, i32) {
    %c0_i32 = arith.constant 0 : i32
    %c0_i32_0 = arith.constant 0 : i32
    %c0_i32_1 = arith.constant 0 : i32
    return %c0_i32, %c0_i32_0 : i32, i32
  }
  func.func @transform_6(%arg0: i32) -> (i32, i32) {
    %c0_i32 = arith.constant 0 : i32
    %c0_i32_0 = arith.constant 0 : i32
    return %arg0, %c0_i32 : i32, i32
  }
}

</mosaic_0001>

<bundles_post_ra>
// kernel: _fourier_block_rows.1
= control target key start
LH: loop header
LB: loop body
LE: loop exit
PB: predicated region body
PF: predicated region fallthrough
CT: control target
= control target key end

     0   :  { %11 = vsyncpa [#allocation3], 0  ;;  %s1023_s0 = inlined_call_operand.hbm [shape: f32[8,128], index: 0, kind: input, shape index: {}]   ;;  %s1024_s1 = inlined_call_operand.hbm [shape: f32[128,128], index: 1, kind: input, shape index: {}]   ;;  %s1025_s2 = inlined_call_operand.hbm [shape: bf16[128,256], index: 2, kind: input, shape index: {}]   ;;  %s1026_s3 = inlined_call_operand.vmem [shape: f32[1,256], index: 3, kind: input, shape index: {}]   ;;  %s1027_s4 = inlined_call_operand.hbm [shape: bf16[256,128], index: 4, kind: input, shape index: {}]   ;;  %s1028_s5 = inlined_call_operand.vmem [shape: f32[8,128], index: 5, kind: input, shape index: {}]   ;;  %s1029_s6 = inlined_call_operand.hbm [shape: f32[8,128], index: 6, kind: output, shape index: {}]  }
   0x1   :  { %12 = vsyncpa [#allocation6], 0 }
   0x2   :  { %13 = vsyncpa [#allocation9], 0 }
   0x3   :  { %14 = vsyncpa [#allocation4], 0  ;;  %s870_s21 = smov [#allocation5]   ;;  %s752_s25 = scalar_lea.hbm %s1024_s1, 2048 }
   0x4   :  { %s30_s22 = sshll.u32 %s870_s21, 4  ;;  %p753_p0 = scmp.ne.s32.totalorder %s1024_s1, %s752_s25  ;;  %s31_s22 = int_to_ptr.vmem [resolvable:$true] %s30_s22 }
   0x5   :  { %p756_p1 = scmp.lt.u32.totalorder %s752_s25, %s1024_s1 }
   0x7   :  { %p758_p2 = pnand %p756_p1, %p753_p0 }
   0x9   :  { %761 = shalt.err (!%p758_p2)
}
   0xa   :  { %s762_s30 = scalar_lea.vmem %s31_s22, 2048  ;;  %p767_p4 = scmp.lt.s32.totalorder %s31_s22, %s31_s22 }
   0xb   :  { %p763_p3 = scmp.ne.s32.totalorder %s31_s22, %s762_s30  ;;  %p768_p5 = scmp.lt.s32.totalorder %s762_s30, %s762_s30 }
   0xd   :  { %p769_p6 = por %p768_p5, %p767_p4 }
   0xf   :  { %p770_p7 = pnand %p769_p6, %p763_p3 }
  0x11   :  { %773 = shalt.err (!%p770_p7)
}
  0x12   :  { %s871_s7 = smov 128   ;;  %s872_s8 = smov 8  }
  0x13   :  { %36 = dma.hbm_to_vmem [thread:$0]  %s1024_s1, 2048, %s31_s22, [#allocation6], %s871_s7, %s871_s7, %s872_s8  }
  0x14   :  { %s873_s11 = smov [#allocation2]   ;;  %s874_s13 = smov [#allocation7]  }
  0x15   :  { %s21_s12 = sshll.u32 %s873_s11, 4  ;;  %s42_s14 = sshll.u32 %s874_s13, 4  ;;  %s22_s12 = int_to_ptr.vmem [resolvable:$true] %s21_s12  ;;  %s43_s14 = int_to_ptr.vmem [resolvable:$true] %s42_s14 }
  0x16   :  { %s774_s17 = scalar_lea.hbm %s1023_s0, 128 }
  0x17   :  { %p775_p8 = scmp.ne.s32.totalorder %s1023_s0, %s774_s17  ;;  %p778_p9 = scmp.lt.u32.totalorder %s774_s17, %s1023_s0 }
  0x19   :  { %p780_p10 = pnand %p778_p9, %p775_p8 }
  0x1b   :  { %783 = shalt.err (!%p780_p10)
}
  0x1c   :  { %s784_s1 = scalar_lea.vmem %s22_s12, 128  ;;  %p789_p12 = scmp.lt.s32.totalorder %s22_s12, %s22_s12 }
  0x1d   :  { %p785_p11 = scmp.ne.s32.totalorder %s22_s12, %s784_s1  ;;  %p790_p13 = scmp.lt.s32.totalorder %s784_s1, %s784_s1 }
  0x1f   :  { %p791_p0 = por %p790_p13, %p789_p12 }
  0x21   :  { %p792_p1 = pnand %p791_p0, %p785_p11 }
  0x23   :  { %795 = shalt.err (!%p792_p1)
}
  0x24   :  { %24 = dma.hbm_to_vmem [thread:$0]  %s1023_s0, 128, %s22_s12, [#allocation3]  }
  0x25   :  { %s796_s26 = scalar_lea.hbm %s1025_s2, 2048 }
  0x26   :  { %p797_p2 = scmp.ne.s32.totalorder %s1025_s2, %s796_s26  ;;  %p800_p3 = scmp.lt.u32.totalorder %s796_s26, %s1025_s2 }
  0x28   :  { %p802_p4 = pnand %p800_p3, %p797_p2 }
  0x2a   :  { %805 = shalt.err (!%p802_p4)
}
  0x2b   :  { %s806_s9 = scalar_lea.vmem %s43_s14, 2048  ;;  %p811_p6 = scmp.lt.s32.totalorder %s43_s14, %s43_s14 }
  0x2c   :  { %p807_p5 = scmp.ne.s32.totalorder %s43_s14, %s806_s9  ;;  %p812_p7 = scmp.lt.s32.totalorder %s806_s9, %s806_s9 }
  0x2e   :  { %p813_p8 = por %p812_p7, %p811_p6 }
  0x30   :  { %p814_p9 = pnand %p813_p8, %p807_p5 }
  0x32   :  { %817 = shalt.err (!%p814_p9)
}
  0x33   :  { %48 = dma.hbm_to_vmem [thread:$0]  %s1025_s2, 2048, %s43_s14, [#allocation6], %s871_s7, %s871_s7, %s872_s8  }
  0x34   :  { %s875_s11 = smov [#allocation8]   ;;  %s818_s16 = scalar_lea.hbm %s1027_s4, 2048 }
  0x35   :  { %s56_s12 = sshll.u32 %s875_s11, 4  ;;  %p819_p10 = scmp.ne.s32.totalorder %s1027_s4, %s818_s16  ;;  %s57_s12 = int_to_ptr.vmem [resolvable:$true] %s56_s12 }
  0x36   :  { %p822_p11 = scmp.lt.u32.totalorder %s818_s16, %s1027_s4 }
  0x38   :  { %p824_p12 = pnand %p822_p11, %p819_p10 }
  0x3a   :  { %827 = shalt.err (!%p824_p12)
}
  0x3b   :  { %s828_s21 = scalar_lea.vmem %s57_s12, 2048  ;;  %p833_p0 = scmp.lt.s32.totalorder %s57_s12, %s57_s12 }
  0x3c   :  { %p829_p13 = scmp.ne.s32.totalorder %s57_s12, %s828_s21  ;;  %p834_p1 = scmp.lt.s32.totalorder %s828_s21, %s828_s21 }
  0x3e   :  { %p835_p2 = por %p834_p1, %p833_p0 }
  0x40   :  { %p836_p3 = pnand %p835_p2, %p829_p13 }
  0x42   :  { %839 = shalt.err (!%p836_p3)
}
  0x43   :  { %s876_s2 = smov 64   ;;  %s877_s7 = smov 4  }
  0x44   :  { %62 = dma.hbm_to_vmem [thread:$0]  %s1027_s4, 2048, %s57_s12, [#allocation9], %s876_s2, %s876_s2, %s877_s7  }
  0x45   :  { %862 = dma.done.wait [#allocation3], 128  }
  0x46   :  { %863 = vsyncadd [#allocation3], 4294967168 }
  0x47   :  { %864 = dma.done.wait [#allocation6], 4096  }
  0x48   :  { %865 = vsyncadd [#allocation6], 4294963200 }
  0x49   :  { %866 = dma.done.wait [#allocation9], 2048  }
  0x4a   :  { %867 = vsyncadd [#allocation9], 4294965248  ;;  %v878_v0 = vmov 0.0|0.0   ;;  %v972_v1 = vld [vmem:[#allocation2] sm:$0xff]  ;;  %v80_v2 = vld [vmem:[#allocation5] sm:$0xff]  ;;  %vm879_vm0 = vmmov 0   ;;  %v160_v35 = vlaneseq }
  0x4b   :  { %671 = vmatprep.subr.bf16.mxu0 %v878_v0  ;;  %v81_v3 = vld [vmem:[#allocation5 + $0x8] sm:$0xff]  ;;  %145 = vadd.xlane.f32.xlu0 %v972_v1  ;;  %v149_v4 = vmul.f32 %v972_v1, %v972_v1  ;;  %v82_v6 = vld [vmem:[#allocation5 + $0x10] sm:$0xff]  ;;  %v83_v7 = vld [vmem:[#allocation5 + $0x18] sm:$0xff]  ;;  %v880_v20 = vmov 0.0  }
  0x4c   :  { %v672_v5 = vpack.c.bf16 %v81_v3, %v80_v2  ;;  %v675_v8 = vpack.c.bf16 %v83_v7, %v82_v6  ;;  %v84_v9 = vld [vmem:[#allocation5 + $0x20] sm:$0xff]  ;;  %v85_v10 = vld [vmem:[#allocation5 + $0x28] sm:$0xff]  ;;  %v86_v12 = vld [vmem:[#allocation5 + $0x30] sm:$0xff]  ;;  %668 = vmatprep.mubr.msk.f32.mxu0 %vm879_vm0, %v880_v20  ;;  %v977_v37 = vshrl.u32 %v160_v35, 7  ;;  %v881_v2 = vmov 0  }
  0x4d   :  { %v678_v11 = vpack.c.bf16 %v85_v10, %v84_v9  ;;  %v87_v13 = vld [vmem:[#allocation5 + $0x38] sm:$0xff]  ;;  %v88_v15 = vld [vmem:[#allocation5 + $0x40] sm:$0xff]  ;;  %v89_v16 = vld [vmem:[#allocation5 + $0x48] sm:$0xff]  ;;  %393 = vmatprep.mubr.bf16.mxu1 %v881_v2 }
  0x4e   :  { %673 = vmatpush3.bf16.msra.mxu0 %v672_v5  ;;  %v681_v14 = vpack.c.bf16 %v87_v13, %v86_v12  ;;  %v684_v17 = vpack.c.bf16 %v89_v16, %v88_v15  ;;  %v90_v18 = vld [vmem:[#allocation5 + $0x50] sm:$0xff]  ;;  %v91_v19 = vld [vmem:[#allocation5 + $0x58] sm:$0xff]  ;;  %v92_v22 = vld [vmem:[#allocation5 + $0x60] sm:$0xff]  ;;  %v162_v38 = vsub.s32 2, %v977_v37  ;;  %v167_v40 = vsub.s32 3, %v977_v37 }
  0x4f   :  { %674 = vmatprep.subr.bf16.mxu0 %v878_v0  ;;  %150 = vadd.xlane.f32.xlu0 %v149_v4  ;;  %v687_v21 = vpack.c.bf16 %v91_v19, %v90_v18  ;;  %v93_v23 = vld [vmem:[#allocation5 + $0x68] sm:$0xff]  ;;  %v94_v25 = vld [vmem:[#allocation5 + $0x70] sm:$0xff]  ;;  %v95_v26 = vld [vmem:[#allocation5 + $0x78] sm:$0xff]  ;;  %v172_v49 = vsub.s32 0, %v977_v37 }
  0x50   :  { %v690_v24 = vpack.c.bf16 %v93_v23, %v92_v22  ;;  %v693_v27 = vpack.c.bf16 %v95_v26, %v94_v25  ;;  %v983_v39 = vld [vmem:[%s1028_s5] sm:$0xff]  ;;  %v708_v48 = vld [vmem:[#allocation7 + $0x4] ss:$8 sps:$4 sm:$0xff]   ;;  %v710_v56 = vld [vmem:[#allocation7] ss:$8 sps:$4 sm:$0xff]  }
  0x51   :  { %v163_v42 = vrot.slane %v983_v39, %v162_v38  ;;  %v168_v45 = vrot.slane %v983_v39, %v167_v40  ;;  %361 = vmatprep.subr.bf16.mxu1 %v708_v48  ;;  %v173_v50 = vrot.slane %v983_v39, %v172_v49  ;;  %v711_v57 = vld [vmem:[#allocation7 + $0x14] ss:$8 sps:$4 sm:$0xff]   ;;  %v713_v58 = vld [vmem:[#allocation7 + $0x10] ss:$8 sps:$4 sm:$0xff]   ;;  %v714_v59 = vld [vmem:[#allocation7 + $0x24] ss:$8 sps:$4 sm:$0xff]  }
  0x52   :  { %676 = vmatpush3.bf16.msra.mxu0 %v675_v8  ;;  %362 = vmatpush1.bf16.msra.mxu1 %v710_v56  ;;  %v716_v60 = vld [vmem:[#allocation7 + $0x20] ss:$8 sps:$4 sm:$0xff]   ;;  %v717_v61 = vld [vmem:[#allocation7 + $0x34] ss:$8 sps:$4 sm:$0xff]   ;;  %v719_v62 = vld [vmem:[#allocation7 + $0x30] ss:$8 sps:$4 sm:$0xff]  }
  0x53   :  { %677 = vmatprep.subr.bf16.mxu0 %v878_v0  ;;  %363 = vmatprep.subr.bf16.mxu1 %v711_v57  ;;  %v720_v63 = vld [vmem:[#allocation7 + $0x44] ss:$8 sps:$4 sm:$0xff]   ;;  %v725_v3 = vld [vmem:[#allocation7 + $0x50] ss:$8 sps:$4 sm:$0xff]   ;;  %v728_v5 = vld [vmem:[#allocation7 + $0x60] ss:$8 sps:$4 sm:$0xff]  }
  0x54   :  { %v726_v4 = vld [vmem:[#allocation7 + $0x64] ss:$8 sps:$4 sm:$0xff]   ;;  %v729_v6 = vld [vmem:[#allocation7 + $0x74] ss:$8 sps:$4 sm:$0xff]   ;;  %v731_v7 = vld [vmem:[#allocation7 + $0x70] ss:$8 sps:$4 sm:$0xff]  }
  0x55   :  { %v732_v8 = vld [vmem:[#allocation8 + $0x40] sm:$0xff]   ;;  %v734_v10 = vld [vmem:[#allocation8 + $0x48] sm:$0xff]   ;;  %v736_v12 = vld [vmem:[#allocation8 + $0x50] sm:$0xff]  }
  0x56   :  { %679 = vmatpush3.bf16.msra.mxu0 %v678_v11  ;;  %364 = vmatpush1.bf16.msra.mxu1 %v713_v58  ;;  %v733_v9 = vld [vmem:[#allocation8] sm:$0xff]   ;;  %v735_v11 = vld [vmem:[#allocation8 + $0x8] sm:$0xff]   ;;  %v737_v13 = vld [vmem:[#allocation8 + $0x10] sm:$0xff]  }
  0x57   :  { %680 = vmatprep.subr.bf16.mxu0 %v878_v0  ;;  %365 = vmatprep.subr.bf16.mxu1 %v714_v59  ;;  %v739_v15 = vld [vmem:[#allocation8 + $0x18] sm:$0xff]   ;;  %v740_v16 = vld [vmem:[#allocation8 + $0x60] sm:$0xff]   ;;  %v742_v18 = vld [vmem:[#allocation8 + $0x68] sm:$0xff]  }
  0x58   :  { %v743_v19 = vld [vmem:[#allocation8 + $0x28] sm:$0xff]   ;;  %v744_v40 = vld [vmem:[#allocation8 + $0x70] sm:$0xff]  }
  0x5a   :  { %682 = vmatpush3.bf16.msra.mxu0 %v681_v14  ;;  %366 = vmatpush1.bf16.msra.mxu1 %v716_v60  ;;  %v738_v14 = vld [vmem:[#allocation8 + $0x58] sm:$0xff]  }
  0x5b   :  { %683 = vmatprep.subr.bf16.mxu0 %v878_v0  ;;  %367 = vmatprep.subr.bf16.mxu1 %v717_v61 }
  0x5e   :  { %685 = vmatpush3.bf16.msra.mxu0 %v684_v17  ;;  %368 = vmatpush1.bf16.msra.mxu1 %v719_v62  ;;  %v741_v17 = vld [vmem:[#allocation8 + $0x20] sm:$0xff]  }
  0x5f   :  { %686 = vmatprep.subr.bf16.mxu0 %v878_v0  ;;  %369 = vmatprep.subr.bf16.mxu1 %v720_v63 }
  0x62   :  { %688 = vmatpush3.bf16.msra.mxu0 %v687_v21 }
  0x63   :  { %689 = vmatprep.subr.bf16.mxu0 %v878_v0 }
  0x66   :  { %691 = vmatpush3.bf16.msra.mxu0 %v690_v24 }
  0x67   :  { %692 = vmatprep.subr.bf16.mxu0 %v878_v0  ;;  %v722_v0 = vld [vmem:[#allocation7 + $0x40] ss:$8 sps:$4 sm:$0xff]  }
  0x68   :  { %370 = vmatpush1.bf16.msra.mxu1 %v722_v0 }
  0x6a   :  { %694 = vmatpush3.bf16.msra.mxu0 %v693_v27 }
  0x6b   :  { %614 = vmatprep.subr.bf16.mxu0 %v732_v8 }
  0xd8   :  { %v146_v28 = vpop.xlane.xlu0 %145 }
  0xd9   :  { %v148_v29 = vmul.f32 0.0078125, %v146_v28  ;;  %v261_v28 = vsub.s32 4, %v977_v37 }
  0xdb   :  { %v153_v31 = vmul.f32 %v148_v29, %v148_v29  ;;  %v156_v41 = vsub.f32 %v972_v1, %v148_v29  ;;  %v266_v29 = vsub.s32 5, %v977_v37 }
  0xdc   :  { %v151_v30 = vpop.xlane.xlu0 %150 }
  0xdd   :  { %v152_v32 = vmul.f32 0.0078125, %v151_v30 }
  0xdf   :  { %v154_v33 = vsub.f32 %v152_v32, %v153_v31  ;;  %v262_v31 = vrot.slane %v983_v39, %v261_v28 }
  0xe1   :  { %v155_v34 = vmax.f32 %v154_v33, 0.0 }
  0xe3   :  { %v157_v36 = vadd.f32 1e-05, %v155_v34  ;;  %v267_v34 = vrot.slane %v983_v39, %v266_v29 }
  0xe5   :  { %748 = vrsqrt.f32 %v157_v36 }
  0xef   :  { %v749_v43 = vpop.eup %748 }
  0xf0   :  { %v159_v44 = vmul.f32 %v749_v43, %v156_v41  ;;  %v745_v41 = vld [vmem:[#allocation8 + $0x30] sm:$0xff]   ;;  %v747_v43 = vld [vmem:[#allocation8 + $0x38] sm:$0xff]  }
  0xf2   :  { %v164_v46 = vmul.f32 %v163_v42, %v159_v44  ;;  %v746_v42 = vld [vmem:[#allocation8 + $0x78] sm:$0xff]  }
  0xf3   :  { %v112_v44 = vld [vmem:[%s1026_s3] sm:$0x3]  ;;  %s882_s3 = smov [#allocation10]  }
  0xf4   :  { %v169_v47 = vadd.f32 %v168_v45, %v164_v46  ;;  %v277_v45 = vsub.s32 1, %v977_v37  ;;  %v274_v46 = vrot.slane %v112_v44, %v172_v49  ;;  %s554_s23 = sshll.u32 %s882_s3, 4  ;;  %s555_s23 = int_to_ptr.vmem [resolvable:$true] %s554_s23 }
  0xf5   :  { %s840_s24 = scalar_lea.vmem %s555_s23, 128  ;;  %p845_p5 = scmp.lt.s32.totalorder %s555_s23, %s555_s23 }
  0xf6   :  { %669 = vmatmul.mubr.f32.vlgmr.msra.gmra.mrb[0].mxu0 %v169_v47  ;;  %v278_v47 = vrot.slane %v112_v44, %v277_v45  ;;  %v409_v60 = vrot.slane %v983_v39, %v277_v45  ;;  %p841_p4 = scmp.ne.s32.totalorder %s555_s23, %s840_s24  ;;  %p846_p6 = scmp.lt.s32.totalorder %s840_s24, %s840_s24 }
  0xf7   :  { %615 = vmatpush3.bf16.msra.mxu0 %v733_v9 }
  0xf8   :  { %616 = vmatprep.subr.bf16.mxu0 %v734_v10  ;;  %p847_p7 = por %p846_p6, %p845_p5 }
  0xfa   :  { %p848_p8 = pnand %p847_p7, %p841_p4 }
  0xfb   :  { %617 = vmatpush3.bf16.msra.mxu0 %v735_v11 }
  0xfc   :  { %618 = vmatprep.subr.bf16.mxu0 %v736_v12 }
  0xff   :  { %619 = vmatpush3.bf16.msra.mxu0 %v737_v13 }
 0x100   :  { %620 = vmatprep.subr.bf16.mxu0 %v738_v14 }
 0x103   :  { %621 = vmatpush3.bf16.msra.mxu0 %v739_v15 }
 0x104   :  { %622 = vmatprep.subr.bf16.mxu0 %v740_v16 }
 0x107   :  { %623 = vmatpush3.bf16.msra.mxu0 %v741_v17 }
 0x108   :  { %624 = vmatprep.subr.bf16.mxu0 %v742_v18 }
 0x10b   :  { %625 = vmatpush3.bf16.msra.mxu0 %v743_v19 }
 0x10c   :  { %626 = vmatprep.subr.bf16.mxu0 %v744_v40 }
 0x10f   :  { %627 = vmatpush3.bf16.msra.mxu0 %v745_v41 }
 0x110   :  { %628 = vmatprep.subr.bf16.mxu0 %v746_v42 }
 0x113   :  { %629 = vmatpush3.bf16.msra.mxu0 %v747_v43 }
 0x1c9   :  { %v240_v51 = vpop.f32.mrb[0].mxu0 }
 0x1ca   :  { %v241_v52 = vadd.f32 %v240_v51, %v173_v50  ;;  %v670_v53 = vpop.f32.mrb[1].mxu0 }
 0x1cc   :  { %v994_v54 = vadd.f32 %v241_v52, %v972_v1  ;;  %v723_v1 = vld [vmem:[#allocation7 + $0x54] ss:$8 sps:$4 sm:$0xff]  }
 0x1cd   :  { %371 = vmatprep.subr.bf16.mxu1 %v723_v1 }
 0x1ce   :  { %245 = vadd.xlane.f32.xlu1 %v994_v54  ;;  %v248_v55 = vmul.f32 %v994_v54, %v994_v54  ;;  %372 = vmatpush1.bf16.msra.mxu1 %v725_v3 }
 0x1cf   :  { %373 = vmatprep.subr.bf16.mxu1 %v726_v4 }
 0x1d2   :  { %249 = vadd.xlane.f32.xlu1 %v248_v55  ;;  %374 = vmatpush1.bf16.msra.mxu1 %v728_v5 }
 0x1d3   :  { %375 = vmatprep.subr.bf16.mxu1 %v729_v6 }
 0x1d6   :  { %376 = vmatpush1.bf16.msra.mxu1 %v731_v7 }
 0x25b   :  { %v246_v20 = vpop.xlane.xlu1 %245 }
 0x25c   :  { %v247_v21 = vmul.f32 0.0078125, %v246_v20 }
 0x25e   :  { %v252_v23 = vmul.f32 %v247_v21, %v247_v21  ;;  %v255_v30 = vsub.f32 %v994_v54, %v247_v21 }
 0x25f   :  { %v250_v22 = vpop.xlane.xlu1 %249 }
 0x260   :  { %v251_v24 = vmul.f32 0.0078125, %v250_v22 }
 0x262   :  { %v253_v25 = vsub.f32 %v251_v24, %v252_v23 }
 0x264   :  { %v254_v26 = vmax.f32 %v253_v25, 0.0 }
 0x266   :  { %v256_v27 = vadd.f32 1e-05, %v254_v26 }
 0x268   :  { %750 = vrsqrt.f32 %v256_v27 }
 0x272   :  { %v751_v32 = vpop.eup %750 }
 0x273   :  { %v258_v33 = vmul.f32 %v751_v32, %v255_v30 }
 0x275   :  { %v263_v35 = vmul.f32 %v262_v31, %v258_v33 }
 0x277   :  { %v268_v36 = vadd.f32 %v267_v34, %v263_v35 }
 0x279   :  { %v269_v38 = vpack.c.bf16 %v268_v36, %v268_v36 }
 0x27b   :  { %394 = vmatmul.mubr.bf16.vlgmr.msra.gmra.mrb[0].mxu1 %v269_v38 }
 0x34e   :  { %v395_v48 = vpop.f32.mrb[0].mxu1 }
 0x34f   :  { %v396_v50 = vadd.f32 %v395_v48, %v274_v46  ;;  %v397_v51 = vpop.f32.mrb[1].mxu1 }
 0x350   :  { %v398_v52 = vadd.f32 %v397_v51, %v278_v47  ;;  %v399_v53 = vpop.f32.mrb[2].mxu1 }
 0x351   :  { %v402_v54 = vmax.f32 %v396_v50, 0.0  ;;  %v400_v55 = vpop.f32.mrb[3].mxu1 }
 0x352   :  { %v403_v56 = vmax.f32 %v398_v52, 0.0 }
 0x353   :  { %v404_v58 = vpack.c.bf16 %v402_v54, %v402_v54 }
 0x354   :  { %v405_v57 = vpack.c.bf16 %v403_v56, %v403_v56 }
 0x356   :  { %538 = vmatprep.mubr.bf16.mxu0 %v405_v57 }
 0x357   :  { %539 = vmatmul.mubr.bf16.vlgmr.msra.gmra.mrb[4].mxu0 %v404_v58 }
 0x42a   :  { %v630_v59 = vpop.f32.mrb[4].mxu0 }
 0x42b   :  { %v631_v61 = vpop.f32.mrb[5].mxu0 }
 0x42c   :  { %v632_v62 = vadd.f32 %v631_v61, %v630_v59  ;;  %v633_v37 = vpop.f32.mrb[6].mxu0 }
 0x42d   :  { %v634_v49 = vpop.f32.mrb[7].mxu0 }
 0x42e   :  { %v541_v63 = vadd.f32 %v632_v62, %v409_v60 }
 0x430   :  { %v546_v0 = vadd.f32 %v541_v63, %v268_v36 }
 0x432   :  { %547 = vst [vmem:[#allocation10] sm:$0xff] %v546_v0 }
 0x433   :  { %851 = shalt.err (!%p848_p8)
}
 0x434   :  { %s852_s27 = scalar_lea.hbm %s1029_s6, 128 }
 0x435   :  { %p853_p9 = scmp.ne.s32.totalorder %s1029_s6, %s852_s27  ;;  %p856_p10 = scmp.lt.u32.totalorder %s852_s27, %s1029_s6 }
 0x437   :  { %p858_p11 = pnand %p856_p10, %p853_p9 }
 0x439   :  { %861 = shalt.err (!%p858_p11)
}
 0x43a   :  { %557 = dma.vmem_to_hbm [thread:$0]  %s555_s23, 128, %s1029_s6, [#allocation4]  }
 0x43b   :  { %868 = dma.done.wait [#allocation4], 128  }
 0x43c   :  { %869 = vsyncadd [#allocation4], 4294967168 }
 0x43d   :  { %561 = vsyncpa [#allocation3], 1 }
 0x43e   :  { %562 = vsyncpa [#allocation6], 1 }
 0x43f   :  { %563 = vsyncpa [#allocation9], 1 }
 0x440   :  { %564 = vsyncpa [#allocation4], 1 }

</bundles_post_ra>
